<compile_context>
chip_gen: v5e
topology: v5e:2x2
jax: 0.10.0
libtpu: 0.0.40
codegen_flags: <defaults>
</compile_context>

<pallas_src>
import functools

import jax
import jax.numpy as jnp
from jax.experimental import pallas as pl
from jax.experimental.pallas import tpu as pltpu


def _round_up(x, m):
    return (x + m - 1) // m * m


def bert_output_kernel(x_ref, res_ref, w_ref, c_ref, o_ref, *, n_pad_cols, inv_h):
    # x_ref:   (TM, Ip)  tile of intermediate activations (native dtype)
    # res_ref: (TM, Hp)  tile of residual (input_tensor)
    # w_ref:   (Ip, Hp)  dense weight (full, zero-padded)
    # c_ref:   (3,  Hp)  f32 constants: [bias; gamma; beta] (zero-padded)
    # o_ref:   (TM, Hp)
    # Native-dtype operands into the MXU; f32 accumulation.
    acc = jnp.dot(x_ref[...], w_ref[...], preferred_element_type=jnp.float32)

    consts = c_ref[...]          # (3, Hp), already f32
    bias = consts[0:1, :]
    gamma = consts[1:2, :]
    beta = consts[2:3, :]

    # TODO(synk): dropout is identity in eval mode; training-mode dropout would
    # need pltpu.prng_seed / pltpu.prng_random_bits.
    h = acc + bias + res_ref[...].astype(jnp.float32)

    # LayerNorm over the *valid* hidden columns only. Padded columns of `h`
    # are exactly zero (zero-padded W columns / bias / residual), so the mean
    # sum is already correct over all Hp columns.
    mean = jnp.sum(h, axis=-1, keepdims=True) * inv_h
    centered = h - mean
    # Over padded columns centered == -mean, so subtract their contribution
    # (n_pad_cols * mean^2) as a scalar correction — no iota / where mask.
    sq_sum = jnp.sum(centered * centered, axis=-1, keepdims=True)
    if n_pad_cols:
        sq_sum = sq_sum - float(n_pad_cols) * (mean * mean)
    var = sq_sum * inv_h
    inv = jax.lax.rsqrt(var + 1e-12)
    # Padded output columns become 0 (gamma/beta zero-padded) and are sliced
    # off in the wrapper anyway.
    o_ref[...] = (centered * inv * gamma + beta).astype(o_ref.dtype)


def bert_output(hidden_states, input_tensor, w, b, gamma, beta, *,
                compute_dtype=None):
    B, S, I = hidden_states.shape
    H = input_tensor.shape[-1]
    M = B * S

    # Lane-dense padded widths (multiples of 128). For standard BERT sizes
    # these already match and no padding copy is made.
    Ip = _round_up(I, 128)
    Hp = _round_up(H, 128)

    out_dtype = hidden_states.dtype
    x_dtype = compute_dtype if compute_dtype is not None else hidden_states.dtype
    w_dtype = compute_dtype if compute_dtype is not None else w.dtype
    xb = jnp.dtype(x_dtype).itemsize
    wb = jnp.dtype(w_dtype).itemsize
    rb = input_tensor.dtype.itemsize
    ob = jnp.dtype(out_dtype).itemsize

    # Device-aware VMEM budget (v7x: 64 MiB, v5e/v6e: 128 MiB).
    try:
        vmem_cap = int(pltpu.get_tpu_info().vmem_capacity_bytes)
    except Exception:
        vmem_cap = 64 * 1024 * 1024
    budget = int(0.9 * vmem_cap)

    def plan_bytes(tile_m):
        # Double-buffered x / res / out tiles, single-buffered weight + consts
        # (pl.Buffered(1)), plus headroom for the f32 LN temporaries.
        return (2 * (tile_m * Ip * xb + tile_m * Hp * rb + tile_m * Hp * ob)
                + (Ip * Hp * wb + 3 * Hp * 4)
                + 4 * tile_m * Hp * 4)

    # Adaptive row tiling: bigger tiles where VMEM allows (128 MiB chips),
    # minimal over-padding, and >= 2 grid steps whenever possible so v7x's
    # two TensorCores both get work; shrink tile if the plan is VMEM-tight.
    tm_cap = 512 if vmem_cap >= 100 * 1024 * 1024 else 256
    tile_m = min(tm_cap, _round_up(M, 8))
    n_steps = pl.cdiv(M, tile_m)
    if n_steps < 2 and M >= 16:
        n_steps = 2
    tile_m = _round_up(pl.cdiv(M, n_steps), 8)
    while plan_bytes(tile_m) > budget and tile_m > 8:
        tile_m = max(8, _round_up(pl.cdiv(tile_m, 2), 8))
    n_steps = pl.cdiv(M, tile_m)
    Mp = n_steps * tile_m

    # Only materialize padding copies when actually required.
    x2 = hidden_states.reshape(M, I)
    if compute_dtype is not None:
        x2 = x2.astype(compute_dtype)
    if Mp != M or Ip != I:
        x2 = jnp.pad(x2, ((0, Mp - M), (0, Ip - I)))

    r2 = input_tensor.reshape(M, H)
    if Mp != M or Hp != H:
        r2 = jnp.pad(r2, ((0, Mp - M), (0, Hp - H)))

    wp = w.astype(compute_dtype) if compute_dtype is not None else w
    if Ip != I or Hp != H:
        wp = jnp.pad(wp, ((0, Ip - I), (0, Hp - H)))

    consts = jnp.stack(
        [b.astype(jnp.float32), gamma.astype(jnp.float32), beta.astype(jnp.float32)],
        axis=0,
    )
    if Hp != H:
        consts = jnp.pad(consts, ((0, 0), (0, Hp - H)))

    vmem_bytes = plan_bytes(tile_m)
    vmem_limit = int(min(max(vmem_bytes, 32 * 1024 * 1024), budget))

    cost = pl.CostEstimate(
        flops=2 * M * I * H,
        transcendentals=M,  # one rsqrt per row
        bytes_accessed=M * I * xb + M * H * rb + M * H * ob + I * H * wb + 3 * H * 4,
    )

    kernel = functools.partial(
        bert_output_kernel, n_pad_cols=Hp - H, inv_h=1.0 / H)

    out = pl.pallas_call(
        kernel,
        out_shape=jax.ShapeDtypeStruct((Mp, Hp), out_dtype),
        grid_spec=pltpu.PrefetchScalarGridSpec(
            num_scalar_prefetch=0,
            grid=(n_steps,),
            in_specs=[
                pl.BlockSpec((tile_m, Ip), lambda i: (i, 0)),  # x tile
                pl.BlockSpec((tile_m, Hp), lambda i: (i, 0)),  # residual tile
                # Grid-invariant blocks: DMA'd once, single-buffered.
                pl.BlockSpec((Ip, Hp), lambda i: (0, 0),
                             pipeline_mode=pl.Buffered(1)),    # weight (full)
                pl.BlockSpec((3, Hp), lambda i: (0, 0),
                             pipeline_mode=pl.Buffered(1)),    # bias/gamma/beta
            ],
            out_specs=pl.BlockSpec((tile_m, Hp), lambda i: (i, 0)),
        ),
        compiler_params=pltpu.CompilerParams(
            dimension_semantics=("parallel",),
            vmem_limit_bytes=vmem_limit,
        ),
        cost_estimate=cost,
    )(x2, r2, wp, consts)

    return out[:M, :H].reshape(B, S, H)


def reference(hidden_states, input_tensor, w, b, gamma, beta):
    h = jnp.einsum("bsi,ih->bsh", hidden_states, w) + b
    h = h + input_tensor
    mean = jnp.mean(h, axis=-1, keepdims=True)
    var = jnp.mean((h - mean) ** 2, axis=-1, keepdims=True)
    return (h - mean) * jax.lax.rsqrt(var + 1e-12) * gamma + beta


if __name__ == "__main__":
    # config.intermediate_size = 64, config.hidden_size = 32
    B, S, I, H = 2, 8, 64, 32

    key = jax.random.PRNGKey(0)
    k1, k2, k3, k4 = jax.random.split(key, 4)

    hidden_states = jax.random.normal(k1, (B, S, I), dtype=jnp.float32)
    input_tensor = jax.random.normal(k2, (B, S, H), dtype=jnp.float32)

    # Deterministic parameter init (nn.Linear-like scale; LN gamma=1, beta=0).
    w = jax.random.normal(k3, (I, H), dtype=jnp.float32) * (1.0 / (I ** 0.5))
    b = jax.random.normal(k4, (H,), dtype=jnp.float32) * 0.02
    gamma = jnp.ones((H,), dtype=jnp.float32)
    beta = jnp.zeros((H,), dtype=jnp.float32)

    out = bert_output(hidden_states, input_tensor, w, b, gamma, beta)
    out = jax.block_until_ready(out)

    ref = reference(hidden_states, input_tensor, w, b, gamma, beta)
    assert out.shape == (B, S, H)
    assert jnp.allclose(out, ref, atol=1e-4, rtol=1e-4)

    print("KERNEL_OK")
</pallas_src>

<mosaic_0001>
module attributes {stable_mosaic.version = 11 : i64} {
  func.func @bert_output_kernel(%arg0: i32, %arg1: memref<8x128xf32, #tpu.memory_space<vmem>>, %arg2: memref<8x128xf32, #tpu.memory_space<vmem>>, %arg3: memref<128x128xf32, #tpu.memory_space<vmem>>, %arg4: memref<3x128xf32, #tpu.memory_space<vmem>>, %arg5: memref<8x128xf32, #tpu.memory_space<vmem>>) attributes {dimension_semantics = [#tpu.dimension_semantics<parallel>], iteration_bounds = array<i64: 2>, scalar_prefetch = 0 : i64, scratch_operands = 0 : i64, tpu.core_type = #tpu.core_type<tc>, window_params = [{transform_indices = @transform_0, window_bounds = array<i64: 8, 128>}, {transform_indices = @transform_1, window_bounds = array<i64: 8, 128>}, {pipeline_mode = #tpu.pipeline_mode<synchronous>, transform_indices = @transform_2, window_bounds = array<i64: 128, 128>}, {pipeline_mode = #tpu.pipeline_mode<synchronous>, transform_indices = @transform_3, window_bounds = array<i64: 3, 128>}, {transform_indices = @transform_4, window_bounds = array<i64: 8, 128>}]} {
    %c0 = arith.constant 0 : index
    %c0_0 = arith.constant 0 : index
    %0 = vector.load %arg1[%c0, %c0_0] : memref<8x128xf32, #tpu.memory_space<vmem>>, vector<8x128xf32>
    %c0_1 = arith.constant 0 : index
    %c0_2 = arith.constant 0 : index
    %1 = vector.load %arg3[%c0_1, %c0_2] : memref<128x128xf32, #tpu.memory_space<vmem>>, vector<128x128xf32>
    %cst = arith.constant dense<0.000000e+00> : vector<8x128xf32>
    %2 = tpu.matmul %0, %1, %cst {dimension_numbers = #tpu.dot_dimension_numbers<[1], [0], [0], [1], [0, 0, 1, 1], [], []>} : vector<8x128xf32>, vector<128x128xf32>, vector<8x128xf32> -> vector<8x128xf32>
    %c0_3 = arith.constant 0 : index
    %c0_4 = arith.constant 0 : index
    %3 = vector.load %arg4[%c0_3, %c0_4] : memref<3x128xf32, #tpu.memory_space<vmem>>, vector<3x128xf32>
    %4 = vector.extract_strided_slice %3 {offsets = [0, 0], sizes = [1, 128], strides = [1, 1]} : vector<3x128xf32> to vector<1x128xf32>
    %5 = vector.extract_strided_slice %3 {offsets = [1, 0], sizes = [1, 128], strides = [1, 1]} : vector<3x128xf32> to vector<1x128xf32>
    %6 = vector.extract_strided_slice %3 {offsets = [2, 0], sizes = [1, 128], strides = [1, 1]} : vector<3x128xf32> to vector<1x128xf32>
    %7 = vector.broadcast %4 : vector<1x128xf32> to vector<8x128xf32>
    %8 = arith.addf %2, %7 : vector<8x128xf32>
    %c0_5 = arith.constant 0 : index
    %c0_6 = arith.constant 0 : index
    %9 = vector.load %arg2[%c0_5, %c0_6] : memref<8x128xf32, #tpu.memory_space<vmem>>, vector<8x128xf32>
    %10 = arith.addf %8, %9 : vector<8x128xf32>
    %cst_7 = arith.constant dense<0.000000e+00> : vector<8xf32>
    %11 = vector.multi_reduction <add>, %10, %cst_7 [1] : vector<8x128xf32> to vector<8xf32>
    %12 = vector.shape_cast %11 : vector<8xf32> to vector<8x1xf32>
    %cst_8 = arith.constant 3.125000e-02 : f32
    %13 = vector.broadcast %cst_8 : f32 to vector<8x1xf32>
    %14 = arith.mulf %12, %13 : vector<8x1xf32>
    %15 = vector.broadcast %14 : vector<8x1xf32> to vector<8x128xf32>
    %16 = arith.subf %10, %15 : vector<8x128xf32>
    %17 = arith.mulf %16, %16 : vector<8x128xf32>
    %cst_9 = arith.constant dense<0.000000e+00> : vector<8xf32>
    %18 = vector.multi_reduction <add>, %17, %cst_9 [1] : vector<8x128xf32> to vector<8xf32>
    %19 = vector.shape_cast %18 : vector<8xf32> to vector<8x1xf32>
    %20 = arith.mulf %14, %14 : vector<8x1xf32>
    %cst_10 = arith.constant 9.600000e+01 : f32
    %21 = vector.broadcast %cst_10 : f32 to vector<8x1xf32>
    %22 = arith.mulf %21, %20 : vector<8x1xf32>
    %23 = arith.subf %19, %22 : vector<8x1xf32>
    %cst_11 = arith.constant 3.125000e-02 : f32
    %24 = vector.broadcast %cst_11 : f32 to vector<8x1xf32>
    %25 = arith.mulf %23, %24 : vector<8x1xf32>
    %cst_12 = arith.constant 9.99999996E-13 : f32
    %26 = vector.broadcast %cst_12 : f32 to vector<8x1xf32>
    %27 = arith.addf %25, %26 : vector<8x1xf32>
    %28 = math.rsqrt %27 : vector<8x1xf32>
    %29 = vector.broadcast %28 : vector<8x1xf32> to vector<8x128xf32>
    %30 = arith.mulf %16, %29 : vector<8x128xf32>
    %31 = vector.broadcast %5 : vector<1x128xf32> to vector<8x128xf32>
    %32 = arith.mulf %30, %31 : vector<8x128xf32>
    %33 = vector.broadcast %6 : vector<1x128xf32> to vector<8x128xf32>
    %34 = arith.addf %32, %33 : vector<8x128xf32>
    %c0_13 = arith.constant 0 : index
    %c0_14 = arith.constant 0 : index
    %35 = vector.load %arg5[%c0_13, %c0_14] : memref<8x128xf32, #tpu.memory_space<vmem>>, vector<8x128xf32>
    tpu.vector_store %arg5[%c0_13, %c0_14], %34 {strides = array<i32>} : memref<8x128xf32, #tpu.memory_space<vmem>>, vector<8x128xf32>,
    return
  }
  func.func @transform_0(%arg0: i32) -> (i32, i32) {
    %c0_i32 = arith.constant 0 : i32
    %c0_i32_0 = arith.constant 0 : i32
    return %arg0, %c0_i32 : i32, i32
  }
  func.func @transform_1(%arg0: i32) -> (i32, i32) {
    %c0_i32 = arith.constant 0 : i32
    %c0_i32_0 = arith.constant 0 : i32
    return %arg0, %c0_i32 : i32, i32
  }
  func.func @transform_2(%arg0: i32) -> (i32, i32) {
    %c0_i32 = arith.constant 0 : i32
    %c0_i32_0 = arith.constant 0 : i32
    %c0_i32_1 = arith.constant 0 : i32
    return %c0_i32, %c0_i32_0 : i32, i32
  }
  func.func @transform_3(%arg0: i32) -> (i32, i32) {
    %c0_i32 = arith.constant 0 : i32
    %c0_i32_0 = arith.constant 0 : i32
    %c0_i32_1 = arith.constant 0 : i32
    return %c0_i32, %c0_i32_0 : i32, i32
  }
  func.func @transform_4(%arg0: i32) -> (i32, i32) {
    %c0_i32 = arith.constant 0 : i32
    %c0_i32_0 = arith.constant 0 : i32
    return %arg0, %c0_i32 : i32, i32
  }
}

</mosaic_0001>

<bundles_post_ra>
// kernel: tpu_custom_call.1
= control target key start
LH: loop header
LB: loop body
LE: loop exit
PB: predicated region body
PF: predicated region fallthrough
CT: control target
= control target key end

     0   :  { %s991_s0 = inlined_call_operand.hbm [shape: f32[16,128], index: 0, kind: input, shape index: {}]   ;;  %s992_s1 = inlined_call_operand.hbm [shape: f32[16,128], index: 1, kind: input, shape index: {}]   ;;  %s993_s2 = inlined_call_operand.hbm [shape: f32[128,128], index: 2, kind: input, shape index: {}]   ;;  %s994_s3 = inlined_call_operand.hbm [shape: f32[3,128], index: 3, kind: input, shape index: {}]   ;;  %s995_s4 = inlined_call_operand.hbm [shape: f32[16,128], index: 4, kind: output, shape index: {}]  }
   0x1   :  { %996 = sst [smem:[#allocation17_spill]] %s993_s2 }
   0x2   :  { %997 = sst [smem:[#allocation18_spill]] %s994_s3 }
   0x3   :  { %9 = vsyncpa [#allocation3], 0 }
   0x4   :  { %11 = vsyncpa [#allocation3 + $0x1], 0 }
   0x5   :  { %12 = vsyncpa [#allocation6], 0 }
   0x6   :  { %14 = vsyncpa [#allocation6 + $0x1], 0 }
   0x7   :  { %15 = vsyncpa [#allocation9], 0 }
   0x8   :  { %16 = vsyncpa [#allocation4], 0 }
   0x9   :  { %18 = vsyncpa [#allocation4 + $0x1], 0  ;;  %s806_s15 = smov 0   ;;  %s808_s16 = smov 0  }
   0xa   :  { %s810_s17 = smov 0   ;;  %s812_s18 = smov 0  }
   0xb LB: > { %s998_s2 = sld [smem:[#allocation17_spill]]  ;;  %s830_s22 = sadd.s32 4294967295, %s775_s18   ;;  %s775_s18 = sphi %s812_s18, %s1012_s18   ;;  %s771_s17 = sphi %s810_s17, %s1011_s17   ;;  %s767_s16 = sphi %s808_s16, %s1010_s16   ;;  %s763_s15 = sphi %s806_s15, %s1009_s15  }
   0xc   : > { %p483_p0 = scmp.ge.s32.totalorder %s775_s18, 1  ;;  %p45_p1 = scmp.eq.s32.totalorder %s830_s22, 0 }
   0xd   : > { %p149_p2 = scmp.lt.s32.totalorder %s775_s18, 3  ;;  %s777_s24 = smov [#allocation7]  }
   0xe   : > { %s162_s25 = sshll.u32 %s777_s24, 4  ;;  %s1000_s3 = sld [smem:[#allocation18_spill]]  ;;  %s163_s25 = int_to_ptr.vmem [resolvable:$true] %s162_s25 }
   0xf   : > { %p835_p3 = pnand %p483_p0, %p149_p2  ;;  %s778_s29 = smov [#allocation8]  }
  0x10   : > { %s177_s30 = sshll.u32 %s778_s29, 4  ;;  %s779_s5 = smov 128   ;;  %s178_s30 = int_to_ptr.vmem [resolvable:$true] %s177_s30 }
  0x11   : > { %s160_s21 = sshll.u32 %s998_s2, 4  ;;  %p515_p4 = pneg %p835_p3  ;;  %s161_s21 = int_to_ptr.hbm [resolvable:$true] %s160_s21 }
  0x12   : > { %s780_s6 = smov 8   ;;  %s482_s7 = sadd.s32 4294967294, %s775_s18  }
  0x13   : > { %p516_p6 = pnand %p515_p4, %p45_p1  ;;  %s849_s8 = sadd.s32 1, %s775_s18  }
  0x14   : > { %s175_s28 = sshll.u32 %s1000_s3, 4  ;;  %s28_s9 = ssub.s32 %s775_s18, %s849_s8  ;;  %s176_s28 = int_to_ptr.hbm [resolvable:$true] %s175_s28 }
  0x15   : > { %518 = dma.hbm_to_vmem [thread:$0]  (!%p516_p6), %s161_s21, 2048, %s163_s25, [#allocation6], %s779_s5, %s779_s5, %s780_s6  }
  0x16   : > { %521 = dma.hbm_to_vmem [thread:$0]  (!%p516_p6), %s176_s28, 64, %s178_s30, [#allocation9]  }
  0x17   : > { %s31_s10 = sadd.s32 1, %s771_s17  ;;  %p29_p7 = scmp.eq.s32.totalorder %s28_s9, 0 }
  0x18   : > { %p38_p8 = scmp.ne.s32.totalorder %s771_s17, %s767_s16  ;;  %p39_p9 = scmp.eq.s32.totalorder %s775_s18, 0 }
  0x19   : > { %p44_p10 = scmp.ne.s32.totalorder %s767_s16, %s763_s15  ;;  %p136_p13 = scmp.eq.s32.totalorder %s830_s22, 1 }
  0x1a   : > { %s860_s11 = scalar_select %p29_p7, %s771_s17, %s31_s10  }
  0x1b   : > { %p862_p11 = por %p39_p9, %p38_p8  ;;  %p868_p12 = por %p45_p1, %p44_p10 }
  0x1c   : > { %1001 = sst [smem:[#allocation16_spill]] %s860_s11  ;;  %p142_p0 = scmp.eq.s32.totalorder %s482_s7, 1 }
  0x1d   : > { %p535_p2 = scmp.lt.s32.totalorder %s775_s18, 2  ;;  %s188_s14 = sand.u32 1, %s771_s17  }
  0x1e   : > { %p875_p4 = por %p136_p13, %p38_p8  ;;  %p879_p6 = por %p142_p0, %p44_p10 }
  0x1f   : > { %s883_s21 = sshll.u32 %s188_s14, 3  ;;  %s488_s24 = sshll.u32 %s775_s18, 3 }
  0x20   : > { %s196_s27 = scalar_lea.hbm %s991_s0, %s488_s24  ;;  %s192_s28 = scalar_lea.vmem [#allocation2], %s883_s21 }
  0x21   : > { %s200_s29 = sshll.u32 %s192_s28, 4  ;;  %s198_s30 = sshll.u32 %s196_s27, 4  ;;  %s201_s29 = int_to_ptr.vmem [resolvable:$true] %s200_s29  ;;  %s199_s30 = int_to_ptr.hbm [resolvable:$true] %s198_s30 }
  0x22   : > { %p892_p7 = pnand %p535_p2, %p862_p11  ;;  %s215_s9 = scalar_lea.hbm %s992_s1, %s488_s24 }
  0x23   : > { %s207_s10 = sand.u32 1, %s775_s18   ;;  %s189_s2 = scalar_lea.sflag [#allocation3], %s188_s14 }
  0x24   : > { %s637_s25 = sshra.s32 %s199_s30, 4  ;;  %p641_p9 = pneg %p892_p7  ;;  %s638_s25 = int_to_ptr.hbm [resolvable:$true] %s637_s25 }
  0x25   : > { %s639_s26 = scalar_lea.hbm %s638_s25, 8  ;;  %s644_s28 = scalar_lea.hbm %s991_s0, 16 }
  0x26   : > { %p640_p8 = scmp.ne.s32.totalorder %s638_s25, %s639_s26  ;;  %p645_p13 = scmp.lt.s32.totalorder %s638_s25, %s991_s0 }
  0x27   : > { %p646_p0 = scmp.lt.s32.totalorder %s644_s28, %s639_s26 }
  0x28   : > { %p642_p10 = pnand %p641_p9, %p640_p8 }
  0x29   : > { %p647_p2 = por %p646_p0, %p645_p13 }
  0x2a   : > { %p643_p11 = pneg %p642_p10 }
  0x2c   : > { %p648_p5 = pnand %p647_p2, %p643_p11 }
  0x2e   : > { %651 = shalt.err (!%p648_p5)
}
  0x2f   : > { %525 = dma.hbm_to_vmem [thread:$0]  (!%p892_p7), %s199_s30, 128, %s201_s29, %s189_s2  }
  0x30   : > { %s217_s14 = sshll.u32 %s215_s9, 4  ;;  %s211_s24 = scalar_lea.vmem [#allocation5], %s883_s21  ;;  %s218_s14 = int_to_ptr.hbm [resolvable:$true] %s217_s14 }
  0x31   : > { %s219_s3 = sshll.u32 %s211_s24, 4  ;;  %s208_s12 = scalar_lea.sflag [#allocation6], %s207_s10  ;;  %s220_s3 = int_to_ptr.vmem [resolvable:$true] %s219_s3 }
  0x32   : > { %s667_s27 = sshra.s32 %s218_s14, 4  ;;  %s674_s28 = scalar_lea.hbm %s992_s1, 16  ;;  %s668_s27 = int_to_ptr.hbm [resolvable:$true] %s667_s27 }
  0x33   : > { %s669_s11 = scalar_lea.hbm %s668_s27, 8  ;;  %p675_p5 = scmp.lt.s32.totalorder %s668_s27, %s992_s1 }
  0x34   : > { %p670_p8 = scmp.ne.s32.totalorder %s668_s27, %s669_s11  ;;  %p676_p13 = scmp.lt.s32.totalorder %s674_s28, %s669_s11 }
  0x36   : > { %p672_p10 = pnand %p670_p8, %p641_p9  ;;  %p677_p0 = por %p676_p13, %p675_p5 }
  0x38   : > { %p673_p11 = pneg %p672_p10 }
  0x3a   : > { %p678_p2 = pnand %p677_p0, %p673_p11 }
  0x3c   : > { %681 = shalt.err (!%p678_p2)
}
  0x3d   : > { %528 = dma.hbm_to_vmem [thread:$0]  (!%p892_p7), %s218_s14, 128, %s220_s3, %s208_s12  }
  0x3e   : > { %228 = sbr.rel (%p835_p3) target bundleno = 508 (0x1fc), region = 36  ;;  %s928_s21 = sand.u32 (!%p835_p3), 1, %s767_s16  }
  0x3f   : > { %s931_s29 = sshll.u32 (!%p835_p3), %s928_s21, 3  ;;  %s231_s30 = scalar_lea.sflag (!%p835_p3), [#allocation3], %s928_s21 }
  0x40   : > { %s234_s11 = scalar_lea.vmem (!%p835_p3), [#allocation2], %s931_s29 }
  0x43   : > { %742 = dma.done.wait (%p868_p12), %s231_s30, 128  }
  0x44   : > { %744 = vsyncadd (%p868_p12), %s231_s30, 4294967168  ;;  %s240_s3 = sand.u32 1, %s830_s22   ;;  %s244_s5 = scalar_lea.vmem [#allocation5], %s931_s29 }
  0x45   : > { %s241_s23 = scalar_lea.sflag [#allocation6], %s240_s3 }
  0x46   : > { %746 = dma.done.wait (%p868_p12), %s241_s23, 128  }
  0x47   : > { %748 = vsyncadd (%p868_p12), %s241_s23, 4294967168 }
  0x48   : > { %750 = dma.done.wait (%p45_p1), [#allocation6], 2048  }
  0x49   : > { %752 = vsyncadd (%p45_p1), [#allocation6], 4294965248 }
  0x4a   : > { %754 = dma.done.wait (%p45_p1), [#allocation9], 64  }
  0x4b   : > { %756 = vsyncadd (%p45_p1), [#allocation9], 4294967232  ;;  %v301_v0 = vld [vmem:[#allocation7 + $0x78] sm:$0xff]  ;;  %v300_v1 = vld [vmem:[#allocation7 + $0x70] sm:$0xff]  ;;  %s498_s13 = sshll.u32 %s830_s22, 3  ;;  %s284_s14 = scalar_lea.vmem [#allocation10], %s931_s29 }
  0x4c   : > { %304 = vmatpush.msra.mxu0 %v301_v0  ;;  %v299_v2 = vld [vmem:[#allocation7 + $0x68] sm:$0xff]  ;;  %v298_v3 = vld [vmem:[#allocation7 + $0x60] sm:$0xff]  ;;  %v297_v4 = vld [vmem:[#allocation7 + $0x58] sm:$0xff]  ;;  %s365_s7 = scalar_lea.hbm %s995_s4, %s498_s13  ;;  %s367_s24 = sshll.u32 %s284_s14, 4  ;;  %s368_s24 = int_to_ptr.vmem [resolvable:$true] %s367_s24 }
  0x4d   : > { %v296_v5 = vld [vmem:[#allocation7 + $0x50] sm:$0xff]  ;;  %v295_v6 = vld [vmem:[#allocation7 + $0x48] sm:$0xff]  ;;  %v294_v7 = vld [vmem:[#allocation7 + $0x40] sm:$0xff]  ;;  %s369_s12 = sshll.u32 %s365_s7, 4  ;;  %s355_s22 = scalar_lea.sflag [#allocation4], %s928_s21  ;;  %s370_s12 = int_to_ptr.hbm [resolvable:$true] %s369_s12 }
  0x4e   : > { %305 = vmatpush.msra.mxu0 %v300_v1  ;;  %v293_v8 = vld [vmem:[#allocation7 + $0x38] sm:$0xff]  ;;  %v292_v9 = vld [vmem:[#allocation7 + $0x30] sm:$0xff]  ;;  %v291_v10 = vld [vmem:[#allocation7 + $0x28] sm:$0xff]  ;;  %s711_s27 = sshra.s32 %s370_s12, 4  ;;  %s717_s6 = scalar_lea.hbm %s995_s4, 16  ;;  %s712_s27 = int_to_ptr.hbm [resolvable:$true] %s711_s27 }
  0x4f   : > { %v290_v11 = vld [vmem:[#allocation7 + $0x20] sm:$0xff]  ;;  %v289_v12 = vld [vmem:[#allocation7 + $0x18] sm:$0xff]  ;;  %v288_v13 = vld [vmem:[#allocation7 + $0x10] sm:$0xff]  ;;  %s713_s25 = scalar_lea.hbm %s712_s27, 8  ;;  %p718_p7 = scmp.lt.s32.totalorder %s712_s27, %s995_s4 }
  0x50   : > { %306 = vmatpush.msra.mxu0 %v299_v2  ;;  %v287_v14 = vld [vmem:[#allocation7 + $0x8] sm:$0xff]  ;;  %v286_v15 = vld [vmem:[#allocation7] sm:$0xff]  ;;  %v324_v20 = vld [vmem:[%s244_s5] sm:$0xff]  ;;  %p714_p1 = scmp.ne.s32.totalorder %s712_s27, %s713_s25  ;;  %p719_p9 = scmp.lt.s32.totalorder %s717_s6, %s713_s25 }
  0x51   : > { %v285_v16 = vld [vmem:[%s234_s11] sm:$0xff] }
  0x52   : > { %307 = vmatpush.msra.mxu0 %v298_v3  ;;  %v302_v17 = vld [vmem:[#allocation8] sm:$0x7]  ;;  %p715_p3 = pnand %p714_p1, %p875_p4  ;;  %p720_p8 = por %p719_p9, %p718_p7 }
  0x53   : > { %v303_v18 = vperm.slane %v302_v17, 0  ;;  %v349_v39 = vperm.slane %v302_v17, 1  ;;  %v351_v41 = vperm.slane %v302_v17, 2 }
  0x54   : > { %308 = vmatpush.msra.mxu0 %v297_v4  ;;  %p716_p12 = pneg %p715_p3 }
  0x56   : > { %309 = vmatpush.msra.mxu0 %v296_v5  ;;  %p721_p10 = pnand %p720_p8, %p716_p12 }
  0x58   : > { %310 = vmatpush.msra.mxu0 %v295_v6 }
  0x5a   : > { %311 = vmatpush.msra.mxu0 %v294_v7 }
  0x5c   : > { %312 = vmatpush.msra.mxu0 %v293_v8 }
  0x5e   : > { %313 = vmatpush.msra.mxu0 %v292_v9 }
  0x60   : > { %314 = vmatpush.msra.mxu0 %v291_v10 }
  0x62   : > { %315 = vmatpush.msra.mxu0 %v290_v11 }
  0x64   : > { %316 = vmatpush.msra.mxu0 %v289_v12 }
  0x66   : > { %317 = vmatpush.msra.mxu0 %v288_v13 }
  0x68   : > { %318 = vmatpush.msra.mxu0 %v287_v14 }
  0x6a   : > { %319 = vmatpush.msra.mxu0 %v286_v15 }
  0x6b   : > { %320 = vmatmul.f32.vlgmr.msra.gmra.mxu0 %v285_v16 }
  0xe8   : > { %v321_v19 = vpop.f32.mrf.mxu0 }
  0xe9   : > { %v322_v21 = vadd.f32 %v321_v19, %v303_v18 }
  0xeb   : > { %v325_v22 = vadd.f32 %v324_v20, %v322_v21 }
  0xed   : > { %326 = vadd.xlane.f32.xlu0 %v325_v22 }
 0x160   : > { %v327_v23 = vpop.xlane.xlu0 %326 }
 0x161   : > { %v328_v24 = vmul.f32 0.03125, %v327_v23 }
 0x163   : > { %v329_v25 = vsub.f32 %v325_v22, %v328_v24  ;;  %v333_v27 = vmul.f32 %v328_v24, %v328_v24 }
 0x165   : > { %v330_v26 = vmul.f32 %v329_v25, %v329_v25  ;;  %v334_v28 = vmul.f32 96.0, %v333_v27 }
 0x167   : > { %331 = vadd.xlane.f32.xlu0 %v330_v26 }
 0x1da   : > { %v332_v29 = vpop.xlane.xlu0 %331 }
 0x1db   : > { %v335_v30 = vsub.f32 %v332_v29, %v334_v28 }
 0x1dd   : > { %v336_v31 = vmul.f32 0.03125, %v335_v30 }
 0x1df   : > { %v337_v32 = vadd.f32 1e-12, %v336_v31 }
 0x1e1   : > { %575 = vrsqrt.f32 %v337_v32  ;;  %vm344_vm1 = vweird.f32 %v337_v32 }
 0x1e7   : > { %v576_v33 = vpop.eup %575 }
 0x1e8   : > { %v339_v34 = vmul.f32 %v576_v33, %v337_v32  ;;  %vm345_vm0 = vweird.f32 %v576_v33 }
 0x1e9   : > { %vm346_vm2 = vmor %vm344_vm1, %vm345_vm0 }
 0x1ea   : > { %v340_v35 = vmul.f32 %v576_v33, %v339_v34 }
 0x1ec   : > { %v341_v36 = vmul.f32 0.5, %v340_v35 }
 0x1ee   : > { %v342_v37 = vsub.f32 1.5, %v341_v36 }
 0x1f0   : > { %v343_v38 = vmul.f32 %v576_v33, %v342_v37 }
 0x1f2   : > { %v347_v40 = vsel %vm346_vm2, %v576_v33, %v343_v38 }
 0x1f3   : > { %v348_v42 = vmul.f32 %v347_v40, %v329_v25 }
 0x1f5   : > { %v350_v43 = vmul.f32 %v349_v39, %v348_v42 }
 0x1f7   : > { %v352_v44 = vadd.f32 %v351_v41, %v350_v43 }
 0x1f9   : > { %353 = vst [vmem:[%s284_s14] sm:$0xff] %v352_v44 }
 0x1fa   : > { %724 = shalt.err (!%p721_p10)
}
 0x1fb   : > { %513 = dma.vmem_to_hbm [thread:$0]  (%p875_p4), %s368_s24, 128, %s370_s12, %s355_s22  }
 0x1fc PF: > { %s381_s21 = sand.u32 1, %s763_s15   ;;  %p1007_p11 = scmp.ge.s32.totalorder %s775_s18, 2 }
 0x1fd   : > { %s382_s30 = scalar_lea.sflag [#allocation4], %s381_s21 }
 0x1fe   : > { %p530_p5 = pnand %p1007_p11, %p879_p6 }
 0x200   : > { %p531_p13 = pneg %p530_p5 }
 0x202   : > { %758 = dma.done.wait (%p531_p13), %s382_s30, 128  }
 0x203   : > { %760 = vsyncadd (%p531_p13), %s382_s30, 4294967168  ;;  %s1008_s11 = sld [smem:[#allocation16_spill]]  ;;  %p21_p0 = scmp.ge.s32.totalorder %s849_s8, 4  }
 0x204   : > { %s1009_s15 = smov %s767_s16  ;;  %s1010_s16 = smov %s771_s17 }
 0x205   : > { %s1012_s18 = smov %s849_s8  ;;  %23 = sbr.rel (!%p21_p0) target bundleno = 11 (0xb), region = 102 }
 0x209   : > { %s1011_s17 = smov %s1008_s11 }
 0x20a   :  { %388 = vsyncpa [#allocation3], 1 }
 0x20b   :  { %390 = vsyncpa [#allocation3 + $0x1], 1 }
 0x20c   :  { %391 = vsyncpa [#allocation6], 1 }
 0x20d   :  { %393 = vsyncpa [#allocation6 + $0x1], 1 }
 0x20e   :  { %394 = vsyncpa [#allocation9], 1 }
 0x20f   :  { %395 = vsyncpa [#allocation4], 1 }
 0x210   :  { %397 = vsyncpa [#allocation4 + $0x1], 1 }

</bundles_post_ra>
